<compile_context>
chip_gen: v7x
topology: tpu7x:2x2x1
jax: 0.10.0
libtpu: 0.0.40
codegen_flags: <defaults>
</compile_context>

<pallas_src>
import functools

import jax
import jax.numpy as jnp
from jax.experimental import pallas as pl
from jax.experimental.pallas import tpu as pltpu

_BN_EPS = 1e-5
_L2_EPS = 1e-12


def _round_up(a, b):
    return (a + b - 1) // b * b


# ---------------------------------------------------------------------------
# Fused kernel (use_bn=True): grid = (2, N, HW_tiles)
#   pass p=0 : conv (+ optional L2 norm), accumulate per-channel sum / sumsq
#   pass p=1 : recompute conv (+ L2), apply BN scale/shift + ReLU, write output
# ---------------------------------------------------------------------------
def _conv_bn_relu_kernel(x_ref, w_ref, b_ref, g_ref, bt_ref, o_ref,
                         sum_ref, ssq_ref, scale_ref, shift_ref,
                         *, l2_norm, inv_m, hw_valid, tile_hw, need_mask):
    p = pl.program_id(0)
    n = pl.program_id(1)
    j = pl.program_id(2)

    @pl.when((p == 0) & (n == 0) & (j == 0))
    def _():
        sum_ref[...] = jnp.zeros_like(sum_ref)
        ssq_ref[...] = jnp.zeros_like(ssq_ref)

    # 1x1 conv: (Cout, Cin) @ (Cin, tile_hw) -> (Cout, tile_hw)   (lane-dense)
    y = jnp.dot(w_ref[...], x_ref[...],
                preferred_element_type=jnp.float32) + b_ref[...]

    if l2_norm:
        # F.normalize(dim=1): per-pixel L2 norm over channels (sublane reduce)
        ss = jnp.sum(y * y, axis=0, keepdims=True)
        y = y * jax.lax.rsqrt(jnp.maximum(ss, _L2_EPS * _L2_EPS))

    @pl.when(p == 0)
    def _():
        if need_mask:
            col = j * tile_hw + jax.lax.broadcasted_iota(
                jnp.int32, (1, tile_hw), 1)
            msk = (col < hw_valid).astype(jnp.float32)
            ym = y * msk
            sum_ref[...] += jnp.sum(ym, axis=1, keepdims=True)
            ssq_ref[...] += jnp.sum(ym * y, axis=1, keepdims=True)
        else:
            sum_ref[...] += jnp.sum(y, axis=1, keepdims=True)
            ssq_ref[...] += jnp.sum(y * y, axis=1, keepdims=True)

    # First step of pass 1: turn accumulated stats into per-channel scale/shift.
    @pl.when((p == 1) & (n == 0) & (j == 0))
    def _():
        mean = sum_ref[...] * inv_m
        var = jnp.maximum(ssq_ref[...] * inv_m - mean * mean, 0.0)
        inv_std = jax.lax.rsqrt(var + _BN_EPS)
        scale = g_ref[...] * inv_std
        scale_ref[...] = scale
        shift_ref[...] = bt_ref[...] - mean * scale

    @pl.when(p == 1)
    def _():
        o_ref[...] = jnp.maximum(y * scale_ref[...] + shift_ref[...], 0.0)


# ---------------------------------------------------------------------------
# Single-pass kernel (use_bn=False): conv (+ optional L2 norm) + fused ReLU
# ---------------------------------------------------------------------------
def _conv_relu_kernel(x_ref, w_ref, b_ref, o_ref, *, l2_norm):
    y = jnp.dot(w_ref[...], x_ref[...],
                preferred_element_type=jnp.float32) + b_ref[...]
    if l2_norm:
        ss = jnp.sum(y * y, axis=0, keepdims=True)
        y = y * jax.lax.rsqrt(jnp.maximum(ss, _L2_EPS * _L2_EPS))
    o_ref[...] = jnp.maximum(y, 0.0)


# ---------------------------------------------------------------------------
# Wrapper
# ---------------------------------------------------------------------------
def conv_bn_layer_forward(x, weight, bias, gamma=None, beta=None, *,
                          use_bn=True, l2_norm=False, stride=1,
                          max_tile_hw=2048):
    """Forward pass of ConvBNLayer.

    x:      (N, Cin, H, W) float32   (NCHW, like PyTorch)
    weight: (Cout, Cin) or (Cout, Cin, 1, 1) float32
    bias:   (Cout,) float32
    gamma:  (Cout,) float32 (BN weight)     [only used when use_bn]
    beta:   (Cout,) float32 (BN bias)       [only used when use_bn]
    """
    x = x.astype(jnp.float32)
    if weight.ndim == 4:
        weight = weight.reshape(weight.shape[0], weight.shape[1])
    if stride != 1:
        # 1x1 conv with stride == spatial subsampling (glue, not the hot path)
        x = x[:, :, ::stride, ::stride]

    n, cin, h, w = x.shape
    cout = weight.shape[0]
    hw = h * w

    # --- spatial (lane-axis) tile selection, VMEM-budget aware --------------
    hw128 = _round_up(hw, 128)
    # keep double-buffered x-block + out-block under ~16 MiB
    budget_lanes = (16 * 2 ** 20) // (2 * 4 * max(cin + cout, 1))
    cap = max(128, min(max_tile_hw, (budget_lanes // 128) * 128))
    tile_hw = 128
    for cand in (256, 512, 1024, 2048, 4096):
        if cand <= min(cap, hw128) and \
                _round_up(hw, cand) - hw <= max(hw // 8, 127):
            tile_hw = cand
    tile_hw = min(tile_hw, hw128, cap)

    hw_pad = _round_up(hw, tile_hw)
    num_tiles = hw_pad // tile_hw
    need_mask = (hw_pad != hw)

    # NCHW -> (N, Cin, HW): free reshape, spatial on the lane axis.
    x3 = x.reshape(n, cin, hw)
    if need_mask:
        x3 = jnp.pad(x3, ((0, 0), (0, 0), (0, hw_pad - hw)))

    w2 = weight.astype(jnp.float32)                       # (Cout, Cin)
    b2 = bias.reshape(cout, 1).astype(jnp.float32)        # (Cout, 1)

    block_bytes = 4 * tile_hw * (cin + cout)
    vmem_limit = int(min(64 * 2 ** 20, max(16 * 2 ** 20, 6 * block_bytes)))

    if use_bn:
        g2 = gamma.reshape(cout, 1).astype(jnp.float32)
        bt2 = beta.reshape(cout, 1).astype(jnp.float32)
        m_total = n * hw  # number of *valid* pixels

        kern = functools.partial(
            _conv_bn_relu_kernel, l2_norm=l2_norm,
            inv_m=1.0 / float(m_total), hw_valid=hw,
            tile_hw=tile_hw, need_mask=need_mask)

        out3 = pl.pallas_call(
            kern,
            out_shape=jax.ShapeDtypeStruct((n, cout, hw_pad), jnp.float32),
            grid_spec=pltpu.PrefetchScalarGridSpec(
                num_scalar_prefetch=0,
                grid=(2, n, num_tiles),
                in_specs=[
                    pl.BlockSpec((None, cin, tile_hw),
                                 lambda p, b, j: (b, 0, j)),
                    pl.BlockSpec((cout, cin), lambda p, b, j: (0, 0)),
                    pl.BlockSpec((cout, 1), lambda p, b, j: (0, 0)),
                    pl.BlockSpec((cout, 1), lambda p, b, j: (0, 0)),
                    pl.BlockSpec((cout, 1), lambda p, b, j: (0, 0)),
                ],
                # pass 0 never writes the output: park it on block (0,0,0)
                # (no flushes); pass 1 visits every block exactly once.
                out_specs=pl.BlockSpec((None, cout, tile_hw),
                                       lambda p, b, j: (b * p, 0, j * p)),
                scratch_shapes=[pltpu.VMEM((cout, 1), jnp.float32)
                                for _ in range(4)],
            ),
            compiler_params=pltpu.CompilerParams(
                dimension_semantics=("arbitrary", "arbitrary", "arbitrary"),
                vmem_limit_bytes=vmem_limit),
        )(x3, w2, b2, g2, bt2)
    else:
        kern = functools.partial(_conv_relu_kernel, l2_norm=l2_norm)
        out3 = pl.pallas_call(
            kern,
            out_shape=jax.ShapeDtypeStruct((n, cout, hw_pad), jnp.float32),
            grid_spec=pltpu.PrefetchScalarGridSpec(
                num_scalar_prefetch=0,
                grid=(n, num_tiles),
                in_specs=[
                    pl.BlockSpec((None, cin, tile_hw), lambda b, j: (b, 0, j)),
                    pl.BlockSpec((cout, cin), lambda b, j: (0, 0)),
                    pl.BlockSpec((cout, 1), lambda b, j: (0, 0)),
                ],
                out_specs=pl.BlockSpec((None, cout, tile_hw),
                                       lambda b, j: (b, 0, j)),
            ),
            compiler_params=pltpu.CompilerParams(
                dimension_semantics=("parallel", "parallel"),
                vmem_limit_bytes=vmem_limit),
        )(x3, w2, b2)

    if need_mask:
        out3 = out3[:, :, :hw]
    return out3.reshape(n, cout, h, w)


# ---------------------------------------------------------------------------
# Pure-JAX reference (mirrors the PyTorch module in default training mode)
# ---------------------------------------------------------------------------
def _reference_forward(x, weight, bias, gamma, beta, *, use_bn, l2_norm,
                       stride=1):
    if stride != 1:
        x = x[:, :, ::stride, ::stride]
    out = jnp.einsum('nchw,oc->nohw', x, weight) + bias[None, :, None, None]
    if l2_norm:
        norm = jnp.sqrt(jnp.sum(out * out, axis=1, keepdims=True))
        out = out / jnp.maximum(norm, _L2_EPS)
    if use_bn:
        mean = out.mean(axis=(0, 2, 3), keepdims=True)
        var = out.var(axis=(0, 2, 3), keepdims=True)  # biased, like BN training
        out = (out - mean) / jnp.sqrt(var + _BN_EPS)
        out = out * gamma[None, :, None, None] + beta[None, :, None, None]
    return jnp.maximum(out, 0.0)


if __name__ == "__main__":
    key = jax.random.PRNGKey(0)
    ks = jax.random.split(key, 6)

    def check(shape, cout, *, use_bn, l2_norm, stride=1, zero_bias=True, tag=""):
        n, cin, h, w = shape
        x = jax.random.normal(ks[0], shape, dtype=jnp.float32)
        # conv1x1 init='normal0.01': weight ~ N(0, 0.01), bias = 0
        weight = 0.01 * jax.random.normal(ks[1], (cout, cin), dtype=jnp.float32)
        bias = (jnp.zeros((cout,), jnp.float32) if zero_bias
                else jax.random.normal(ks[2], (cout,), dtype=jnp.float32))
        gamma = jnp.ones((cout,), jnp.float32) \
            + 0.1 * jax.random.normal(ks[3], (cout,), dtype=jnp.float32)
        beta = 0.1 * jax.random.normal(ks[4], (cout,), dtype=jnp.float32)

        out = conv_bn_layer_forward(x, weight, bias, gamma, beta,
                                    use_bn=use_bn, l2_norm=l2_norm,
                                    stride=stride)
        out = jax.block_until_ready(out)
        ref = _reference_forward(x, weight, bias, gamma, beta,
                                 use_bn=use_bn, l2_norm=l2_norm, stride=stride)
        assert out.shape == ref.shape, (tag, out.shape, ref.shape)
        err = jnp.max(jnp.abs(out - ref))
        assert jnp.allclose(out, ref, atol=2e-4, rtol=2e-4), \
            f"{tag}: max err {err}"

    # Module config from the spec: ConvBNLayer(inplanes=4, planes=8, use_bn=True)
    check((2, 4, 16, 16), 8, use_bn=True, l2_norm=False, tag="bn")
    # L2-norm + BN
    check((2, 4, 16, 16), 8, use_bn=True, l2_norm=True, tag="l2+bn")
    # no BN (ReLU fused into the single-pass kernel)
    check((2, 4, 16, 16), 8, use_bn=False, l2_norm=False, tag="no_bn")
    # strided conv (spatial subsampling path)
    check((2, 4, 16, 16), 8, use_bn=True, l2_norm=False, stride=2, tag="stride2")
    # non-128-divisible spatial + nonzero bias: exercises padded-tail masking
    check((2, 4, 5, 5), 8, use_bn=True, l2_norm=False, zero_bias=False,
          tag="bn_pad")

    print("KERNEL_OK")
</pallas_src>

<mosaic_0001>
module attributes {stable_mosaic.version = 11 : i64} {
  func.func @_conv_bn_relu_kernel(%arg0: i32, %arg1: i32, %arg2: i32, %arg3: memref<1x4x256xf32, #tpu.memory_space<vmem>>, %arg4: memref<8x4xf32, #tpu.memory_space<vmem>>, %arg5: memref<8x1xf32, #tpu.memory_space<vmem>>, %arg6: memref<8x1xf32, #tpu.memory_space<vmem>>, %arg7: memref<8x1xf32, #tpu.memory_space<vmem>>, %arg8: memref<1x8x256xf32, #tpu.memory_space<vmem>>, %arg9: memref<8x1xf32, #tpu.memory_space<vmem>>, %arg10: memref<8x1xf32, #tpu.memory_space<vmem>>, %arg11: memref<8x1xf32, #tpu.memory_space<vmem>>, %arg12: memref<8x1xf32, #tpu.memory_space<vmem>>) attributes {dimension_semantics = [#tpu.dimension_semantics<arbitrary>, #tpu.dimension_semantics<arbitrary>, #tpu.dimension_semantics<arbitrary>], iteration_bounds = array<i64: 2, 2, 1>, scalar_prefetch = 0 : i64, scratch_operands = 4 : i64, tpu.core_type = #tpu.core_type<tc>, window_params = [{transform_indices = @transform_0, window_bounds = array<i64: 1, 4, 256>}, {pipeline_mode = #tpu.pipeline_mode<synchronous>, transform_indices = @transform_1, window_bounds = array<i64: 8, 4>}, {pipeline_mode = #tpu.pipeline_mode<synchronous>, transform_indices = @transform_2, window_bounds = array<i64: 8, 1>}, {pipeline_mode = #tpu.pipeline_mode<synchronous>, transform_indices = @transform_3, window_bounds = array<i64: 8, 1>}, {pipeline_mode = #tpu.pipeline_mode<synchronous>, transform_indices = @transform_4, window_bounds = array<i64: 8, 1>}, {transform_indices = @transform_5, window_bounds = array<i64: 1, 8, 256>}]} {
    %c0_i32 = arith.constant 0 : i32
    %0 = arith.cmpi eq, %arg0, %c0_i32 : i32
    %c0_i32_0 = arith.constant 0 : i32
    %1 = arith.cmpi eq, %arg1, %c0_i32_0 : i32
    %2 = arith.andi %0, %1 : i1
    %c0_i32_1 = arith.constant 0 : i32
    %3 = arith.cmpi eq, %arg2, %c0_i32_1 : i32
    %4 = arith.andi %2, %3 : i1
    %5 = arith.extui %4 : i1 to i32
    %c0_i32_2 = arith.constant 0 : i32
    %6 = arith.cmpi ne, %5, %c0_i32_2 : i32
    scf.if %6 {
      %cst_16 = arith.constant 0.000000e+00 : f32
      %27 = vector.broadcast %cst_16 : f32 to vector<8x1xf32>
      %c0_17 = arith.constant 0 : index
      %c0_18 = arith.constant 0 : index
      %28 = vector.load %arg9[%c0_17, %c0_18] : memref<8x1xf32, #tpu.memory_space<vmem>>, vector<8x1xf32>
      tpu.vector_store %arg9[%c0_17, %c0_18], %27 {strides = array<i32>} : memref<8x1xf32, #tpu.memory_space<vmem>>, vector<8x1xf32>,
      %cst_19 = arith.constant 0.000000e+00 : f32
      %29 = vector.broadcast %cst_19 : f32 to vector<8x1xf32>
      %c0_20 = arith.constant 0 : index
      %c0_21 = arith.constant 0 : index
      %30 = vector.load %arg10[%c0_20, %c0_21] : memref<8x1xf32, #tpu.memory_space<vmem>>, vector<8x1xf32>
      tpu.vector_store %arg10[%c0_20, %c0_21], %29 {strides = array<i32>} : memref<8x1xf32, #tpu.memory_space<vmem>>, vector<8x1xf32>,
    } else {
    }
    %c0 = arith.constant 0 : index
    %c0_3 = arith.constant 0 : index
    %7 = vector.load %arg4[%c0, %c0_3] : memref<8x4xf32, #tpu.memory_space<vmem>>, vector<8x4xf32>
    %c0_4 = arith.constant 0 : index
    %c0_5 = arith.constant 0 : index
    %c0_6 = arith.constant 0 : index
    %8 = vector.load %arg3[%c0_4, %c0_5, %c0_6] : memref<1x4x256xf32, #tpu.memory_space<vmem>>, vector<1x4x256xf32>
    %9 = vector.shape_cast %8 : vector<1x4x256xf32> to vector<4x256xf32>
    %cst = arith.constant dense<0.000000e+00> : vector<8x256xf32>
    %10 = tpu.matmul %7, %9, %cst {dimension_numbers = #tpu.dot_dimension_numbers<[1], [0], [0], [1], [0, 0, 1, 1], [], []>} : vector<8x4xf32>, vector<4x256xf32>, vector<8x256xf32> -> vector<8x256xf32>
    %c0_7 = arith.constant 0 : index
    %c0_8 = arith.constant 0 : index
    %11 = vector.load %arg5[%c0_7, %c0_8] : memref<8x1xf32, #tpu.memory_space<vmem>>, vector<8x1xf32>
    %12 = vector.broadcast %11 : vector<8x1xf32> to vector<8x256xf32>
    %13 = arith.addf %10, %12 : vector<8x256xf32>
    %c0_i32_9 = arith.constant 0 : i32
    %14 = arith.cmpi eq, %arg0, %c0_i32_9 : i32
    %15 = arith.extui %14 : i1 to i32
    %c0_i32_10 = arith.constant 0 : i32
    %16 = arith.cmpi ne, %15, %c0_i32_10 : i32
    scf.if %16 {
      %c0_16 = arith.constant 0 : index
      %c0_17 = arith.constant 0 : index
      %27 = vector.load %arg9[%c0_16, %c0_17] : memref<8x1xf32, #tpu.memory_space<vmem>>, vector<8x1xf32>
      %cst_18 = arith.constant dense<0.000000e+00> : vector<8xf32>
      %28 = vector.multi_reduction <add>, %13, %cst_18 [1] : vector<8x256xf32> to vector<8xf32>
      %29 = vector.shape_cast %28 : vector<8xf32> to vector<8x1xf32>
      %30 = arith.addf %27, %29 : vector<8x1xf32>
      %c0_19 = arith.constant 0 : index
      %c0_20 = arith.constant 0 : index
      %31 = vector.load %arg9[%c0_19, %c0_20] : memref<8x1xf32, #tpu.memory_space<vmem>>, vector<8x1xf32>
      tpu.vector_store %arg9[%c0_19, %c0_20], %30 {strides = array<i32>} : memref<8x1xf32, #tpu.memory_space<vmem>>, vector<8x1xf32>,
      %c0_21 = arith.constant 0 : index
      %c0_22 = arith.constant 0 : index
      %32 = vector.load %arg10[%c0_21, %c0_22] : memref<8x1xf32, #tpu.memory_space<vmem>>, vector<8x1xf32>
      %33 = arith.mulf %13, %13 : vector<8x256xf32>
      %cst_23 = arith.constant dense<0.000000e+00> : vector<8xf32>
      %34 = vector.multi_reduction <add>, %33, %cst_23 [1] : vector<8x256xf32> to vector<8xf32>
      %35 = vector.shape_cast %34 : vector<8xf32> to vector<8x1xf32>
      %36 = arith.addf %32, %35 : vector<8x1xf32>
      %c0_24 = arith.constant 0 : index
      %c0_25 = arith.constant 0 : index
      %37 = vector.load %arg10[%c0_24, %c0_25] : memref<8x1xf32, #tpu.memory_space<vmem>>, vector<8x1xf32>
      tpu.vector_store %arg10[%c0_24, %c0_25], %36 {strides = array<i32>} : memref<8x1xf32, #tpu.memory_space<vmem>>, vector<8x1xf32>,
    } else {
    }
    %c1_i32 = arith.constant 1 : i32
    %17 = arith.cmpi eq, %arg0, %c1_i32 : i32
    %c0_i32_11 = arith.constant 0 : i32
    %18 = arith.cmpi eq, %arg1, %c0_i32_11 : i32
    %19 = arith.andi %17, %18 : i1
    %c0_i32_12 = arith.constant 0 : i32
    %20 = arith.cmpi eq, %arg2, %c0_i32_12 : i32
    %21 = arith.andi %19, %20 : i1
    %22 = arith.extui %21 : i1 to i32
    %c0_i32_13 = arith.constant 0 : i32
    %23 = arith.cmpi ne, %22, %c0_i32_13 : i32
    scf.if %23 {
      %c0_16 = arith.constant 0 : index
      %c0_17 = arith.constant 0 : index
      %27 = vector.load %arg9[%c0_16, %c0_17] : memref<8x1xf32, #tpu.memory_space<vmem>>, vector<8x1xf32>
      %cst_18 = arith.constant 0.001953125 : f32
      %28 = vector.broadcast %cst_18 : f32 to vector<8x1xf32>
      %29 = arith.mulf %27, %28 : vector<8x1xf32>
      %c0_19 = arith.constant 0 : index
      %c0_20 = arith.constant 0 : index
      %30 = vector.load %arg10[%c0_19, %c0_20] : memref<8x1xf32, #tpu.memory_space<vmem>>, vector<8x1xf32>
      %cst_21 = arith.constant 0.001953125 : f32
      %31 = vector.broadcast %cst_21 : f32 to vector<8x1xf32>
      %32 = arith.mulf %30, %31 : vector<8x1xf32>
      %33 = arith.mulf %29, %29 : vector<8x1xf32>
      %34 = arith.subf %32, %33 : vector<8x1xf32>
      %cst_22 = arith.constant 0.000000e+00 : f32
      %35 = vector.broadcast %cst_22 : f32 to vector<8x1xf32>
      %36 = arith.maximumf %34, %35 : vector<8x1xf32>
      %cst_23 = arith.constant 9.99999974E-6 : f32
      %37 = vector.broadcast %cst_23 : f32 to vector<8x1xf32>
      %38 = arith.addf %36, %37 : vector<8x1xf32>
      %39 = math.rsqrt %38 : vector<8x1xf32>
      %c0_24 = arith.constant 0 : index
      %c0_25 = arith.constant 0 : index
      %40 = vector.load %arg6[%c0_24, %c0_25] : memref<8x1xf32, #tpu.memory_space<vmem>>, vector<8x1xf32>
      %41 = arith.mulf %40, %39 : vector<8x1xf32>
      %c0_26 = arith.constant 0 : index
      %c0_27 = arith.constant 0 : index
      %42 = vector.load %arg11[%c0_26, %c0_27] : memref<8x1xf32, #tpu.memory_space<vmem>>, vector<8x1xf32>
      tpu.vector_store %arg11[%c0_26, %c0_27], %41 {strides = array<i32>} : memref<8x1xf32, #tpu.memory_space<vmem>>, vector<8x1xf32>,
      %c0_28 = arith.constant 0 : index
      %c0_29 = arith.constant 0 : index
      %43 = vector.load %arg7[%c0_28, %c0_29] : memref<8x1xf32, #tpu.memory_space<vmem>>, vector<8x1xf32>
      %44 = arith.mulf %29, %41 : vector<8x1xf32>
      %45 = arith.subf %43, %44 : vector<8x1xf32>
      %c0_30 = arith.constant 0 : index
      %c0_31 = arith.constant 0 : index
      %46 = vector.load %arg12[%c0_30, %c0_31] : memref<8x1xf32, #tpu.memory_space<vmem>>, vector<8x1xf32>
      tpu.vector_store %arg12[%c0_30, %c0_31], %45 {strides = array<i32>} : memref<8x1xf32, #tpu.memory_space<vmem>>, vector<8x1xf32>,
    } else {
    }
    %c1_i32_14 = arith.constant 1 : i32
    %24 = arith.cmpi eq, %arg0, %c1_i32_14 : i32
    %25 = arith.extui %24 : i1 to i32
    %c0_i32_15 = arith.constant 0 : i32
    %26 = arith.cmpi ne, %25, %c0_i32_15 : i32
    scf.if %26 {
      %c0_16 = arith.constant 0 : index
      %c0_17 = arith.constant 0 : index
      %27 = vector.load %arg11[%c0_16, %c0_17] : memref<8x1xf32, #tpu.memory_space<vmem>>, vector<8x1xf32>
      %28 = vector.broadcast %27 : vector<8x1xf32> to vector<8x256xf32>
      %29 = arith.mulf %13, %28 : vector<8x256xf32>
      %c0_18 = arith.constant 0 : index
      %c0_19 = arith.constant 0 : index
      %30 = vector.load %arg12[%c0_18, %c0_19] : memref<8x1xf32, #tpu.memory_space<vmem>>, vector<8x1xf32>
      %31 = vector.broadcast %30 : vector<8x1xf32> to vector<8x256xf32>
      %32 = arith.addf %29, %31 : vector<8x256xf32>
      %cst_20 = arith.constant 0.000000e+00 : f32
      %33 = vector.broadcast %cst_20 : f32 to vector<8x256xf32>
      %34 = arith.maximumf %32, %33 : vector<8x256xf32>
      %c0_21 = arith.constant 0 : index
      %c0_22 = arith.constant 0 : index
      %c0_23 = arith.constant 0 : index
      %35 = vector.load %arg8[%c0_21, %c0_22, %c0_23] : memref<1x8x256xf32, #tpu.memory_space<vmem>>, vector<1x8x256xf32>
      %36 = vector.shape_cast %35 : vector<1x8x256xf32> to vector<8x256xf32>
      %37 = vector.shape_cast %34 : vector<8x256xf32> to vector<1x8x256xf32>
      tpu.vector_store %arg8[%c0_21, %c0_22, %c0_23], %37 {strides = array<i32>} : memref<1x8x256xf32, #tpu.memory_space<vmem>>, vector<1x8x256xf32>,
    } else {
    }
    return
  }
  func.func @transform_0(%arg0: i32, %arg1: i32, %arg2: i32) -> (i32, i32, i32) {
    %c0_i32 = arith.constant 0 : i32
    %c0_i32_0 = arith.constant 0 : i32
    return %arg1, %c0_i32, %arg2 : i32, i32, i32
  }
  func.func @transform_1(%arg0: i32, %arg1: i32, %arg2: i32) -> (i32, i32) {
    %c0_i32 = arith.constant 0 : i32
    %c0_i32_0 = arith.constant 0 : i32
    %c0_i32_1 = arith.constant 0 : i32
    return %c0_i32, %c0_i32_0 : i32, i32
  }
  func.func @transform_2(%arg0: i32, %arg1: i32, %arg2: i32) -> (i32, i32) {
    %c0_i32 = arith.constant 0 : i32
    %c0_i32_0 = arith.constant 0 : i32
    %c0_i32_1 = arith.constant 0 : i32
    return %c0_i32, %c0_i32_0 : i32, i32
  }
  func.func @transform_3(%arg0: i32, %arg1: i32, %arg2: i32) -> (i32, i32) {
    %c0_i32 = arith.constant 0 : i32
    %c0_i32_0 = arith.constant 0 : i32
    %c0_i32_1 = arith.constant 0 : i32
    return %c0_i32, %c0_i32_0 : i32, i32
  }
  func.func @transform_4(%arg0: i32, %arg1: i32, %arg2: i32) -> (i32, i32) {
    %c0_i32 = arith.constant 0 : i32
    %c0_i32_0 = arith.constant 0 : i32
    %c0_i32_1 = arith.constant 0 : i32
    return %c0_i32, %c0_i32_0 : i32, i32
  }
  func.func @transform_5(%arg0: i32, %arg1: i32, %arg2: i32) -> (i32, i32, i32) {
    %0 = arith.muli %arg1, %arg0 : i32
    %1 = arith.muli %arg2, %arg0 : i32
    %c0_i32 = arith.constant 0 : i32
    %c0_i32_0 = arith.constant 0 : i32
    return %0, %c0_i32, %1 : i32, i32, i32
  }
}

</mosaic_0001>

<bundles_post_ra>
// kernel: tpu_custom_call.1
= control target key start
LH: loop header
LB: loop body
LE: loop exit
PB: predicated region body
PF: predicated region fallthrough
CT: control target
= control target key end

     0   :  { %10 = vsyncpa [#allocation7], 0  ;;  %s926_s0 = inlined_call_operand.vmem [shape: f32[2,4,256], index: 0, kind: input, shape index: {}]   ;;  %s927_s1 = inlined_call_operand.vmem [shape: f32[8,4], index: 1, kind: input, shape index: {}]   ;;  %s928_s2 = inlined_call_operand.vmem [shape: f32[8,1], index: 2, kind: input, shape index: {}]   ;;  %s929_s3 = inlined_call_operand.vmem [shape: f32[8,1], index: 3, kind: input, shape index: {}]   ;;  %s930_s4 = inlined_call_operand.vmem [shape: f32[8,1], index: 4, kind: input, shape index: {}]   ;;  %s931_s5 = inlined_call_operand.hbm [shape: f32[2,8,256], index: 5, kind: output, shape index: {}]  }
   0x1   :  { %12 = vsyncpa [#allocation7 + $0x1], 0  ;;  %s768_s18 = smov 0   ;;  %s770_s19 = smov 0  }
   0x2   :  { %s772_s20 = smov 0   ;;  %s774_s21 = smov 0  }
   0x3   :  { %s776_s22 = smov 0   ;;  %s778_s23 = smov 0  }
   0x4   :  { %s780_s24 = smov 0   ;;  %s782_s25 = smov 0  }
   0x5 LB: > { %s535_s26 = sadd.s32 4294967295, %s731_s25   ;;  %s536_s27 = sadd.s32 4294967294, %s731_s25   ;;  %s731_s25 = sphi %s782_s25, %s18_s25   ;;  %s727_s24 = sphi %s780_s24, %s940_s24   ;;  %s723_s23 = sphi %s778_s23, %s939_s23   ;;  %s719_s22 = sphi %s776_s22, %s938_s22   ;;  %s715_s21 = sphi %s774_s21, %s937_s21   ;;  %s711_s20 = sphi %s772_s20, %s936_s20   ;;  %s707_s19 = sphi %s770_s19, %s935_s19   ;;  %s703_s18 = sphi %s768_s18, %s934_s18  }
   0x6   : > { %s33_s28 = sadd.s32 1, %s723_s23  ;;  %s37_s29 = sadd.s32 1, %s727_s24 }
   0x7   : > { %p35_p0 = scmp.ge.s32.totalorder %s33_s28, 2  ;;  %s153_s30 = smul.u32 %s723_s23, %s727_s24 }
   0x8   : > { %p172_p1 = scmp.ne.s32.totalorder %s711_s20, %s707_s19  ;;  %p173_p2 = scmp.eq.s32.totalorder %s535_s26, 3 }
   0x9   : > { %s942_s28 = smov (%p35_p0, %s33_s28), 0  ;;  %s944_s29 = smov (!%p35_p0, %s37_s29), %s727_s24 }
   0xa   : > { %p178_p3 = scmp.ne.s32.totalorder %s707_s19, %s703_s18  ;;  %p39_p4 = scmp.ge.s32.totalorder %s944_s29, 2 }
   0xb   : > { %p179_p5 = scmp.eq.s32.totalorder %s536_s27, 3  ;;  %p821_p6 = por %p173_p2, %p172_p1 }
   0xc   : > { %p539_p7 = scmp.ge.s32.totalorder %s731_s25, 1  ;;  %s946_s29 = smov (%p39_p4, %s944_s29), 0 }
   0xd   : > { %p828_p8 = por %p179_p5, %p178_p3  ;;  %p222_p9 = scmp.lt.s32.totalorder %s731_s25, 5 }
   0xe   : > { %s155_s8 = smul.u32 %s946_s29, %s942_s28  ;;  %s162_s10 = sadd.s32 1, %s711_s20 }
   0xf   : > { %p223_p10 = pnand %p539_p7, %p222_p9 }
  0x10   : > { %s157_s9 = ssub.s32 %s153_s30, %s155_s8  ;;  %s251_s12 = sand.u32 (!%p223_p10), 1, %s707_s19  }
  0x11   : > { %p160_p11 = scmp.eq.s32.totalorder %s157_s9, 0  ;;  %226 = sbr.rel (%p223_p10) target bundleno = 601 (0x259), region = 40 }
  0x12   : > { %p255_p12 = scmp.lt.s32.totalorder (!%p223_p10), %s715_s21, 1  ;;  %s540_s13 = sshll.u32 (!%p223_p10), %s251_s12, 4 }
  0x13   : > { %s837_s11 = scalar_select %p160_p11, %s711_s20, %s162_s10  }
  0x14   : > { %p267_p13 = scmp.eq.s32.totalorder (!%p223_p10), %s719_s22, 0  ;;  %p268_p0 = scmp.eq.s32.totalorder (!%p223_p10), %s715_s21, 0 }
  0x15   : > { %s851_s27 = scalar_lea.vmem (!%p223_p10), [#allocation6], %s540_s13 }
  0x16   : > { %p269_p1 = pnand (!%p223_p10), %p268_p0, %p267_p13 }
  0x18   : > { %s256_s14 = scalar_select %p255_p12, %s715_s21, 1 }
  0x19   : > { %275 = sbr.rel (%p269_p1) target bundleno = 32 (0x20), region = 44  ;;  %vm276_vm0 = vcmask (!%p269_p1), 7168   ;;  %v733_v0 = vmov (!%p269_p1), 0.0  }
  0x1a   : > { %s555_s15 = sshll.u32 %s256_s14, 3  ;;  %277 = vst.msk [vmem:[#allocation2] sm:$0xff] (!%p269_p1), %vm276_vm0, %v733_v0  ;;  %278 = vst.msk [vmem:[#allocation3] sm:$0xff] (!%p269_p1), %vm276_vm0, %v733_v0 }
  0x1b   : > { %s262_s26 = scalar_lea.vmem %s926_s0, %s555_s15 }
  0x20 PF: > { %v280_v1 = vld [vmem:[%s262_s26] sm:$0xff]  ;;  %vm293_vm1 = vcmask 1043456   ;;  %v734_v3 = vmov 0.0   ;;  %v735_v4 = vmov 0   ;;  %vm289_vm2 = vcmask 31744   ;;  %p547_p2 = scmp.ne.s32.totalorder %s719_s22, 0 }
  0x21   : > { %v288_v2 = vcombine.high %v280_v1, %v280_v1  ;;  %362 = vmatprep.mubr.f32.mxu0 %v734_v3  ;;  %632 = vset.pattern.permute.xlu0 %v735_v4  ;;  %v281_v5 = vld [vmem:[%s928_s2] sm:$0xff]  ;;  %vm377_vm3 = vcmask (!%p547_p2), 7168   ;;  %v379_v19 = vld [vmem:[#allocation3] sm:$0xff] (!%p547_p2) }
  0x22   : > { %v279_v6 = vld [vmem:[%s927_s1] sm:$0xff]  ;;  %284 = vperm.xlu0 %632, %v281_v5  }
  0x23   : > { %544 = vmatprep.subr.msk.mxu0 %vm293_vm1, %v288_v2  ;;  %v372_v16 = vld [vmem:[#allocation2] sm:$0xff] (!%p547_p2) }
  0x24   : > { %545 = vmatpush1.msk.msra.mxu0 %vm293_vm1, %v280_v1 }
  0x25   : > { %546 = vmatmul.mubr.msk.f32.vlgmr.msra.gmra.mrb[0].mxu0 %vm289_vm2, %v279_v6 }
  0xa1   : > { %v285_v7 = vpop.permute.xlu0 %284 }
  0xf4   : > { %371 = sbr.rel (%p547_p2) target bundleno = 403 (0x193), region = 48 }
  0xf8   : > { %v364_v8 = vpop.f32.mrb[0].mxu0 }
  0xf9   : > { %v365_v9 = vadd.f32 %v364_v8, %v285_v7  ;;  %v366_v10 = vpop.f32.mrb[1].mxu0 }
  0xfa   : > { %v367_v11 = vadd.f32 %v366_v10, %v285_v7 }
  0xfb   : > { %v380_v13 = vmul.f32 %v365_v9, %v365_v9 }
  0xfc   : > { %v373_v12 = vadd.f32 %v367_v11, %v365_v9  ;;  %v381_v14 = vmul.f32 %v367_v11, %v367_v11 }
  0xfe   : > { %374 = vadd.xlane.f32.xlu0 %v373_v12  ;;  %v382_v15 = vadd.f32 %v381_v14, %v380_v13 }
 0x102   : > { %383 = vadd.xlane.f32.xlu0 %v382_v15 }
 0x18b   : > { %v375_v17 = vpop.xlane.xlu0 %374 }
 0x18c   : > { %v376_v18 = vadd.f32 %v375_v17, %v372_v16 }
 0x18e   : > { %378 = vst.msk [vmem:[#allocation2] sm:$0xff] %vm377_vm3, %v376_v18 }
 0x18f   : > { %v384_v20 = vpop.xlane.xlu0 %383 }
 0x190   : > { %v385_v21 = vadd.f32 %v384_v20, %v379_v19 }
 0x192   : > { %386 = vst.msk [vmem:[#allocation3] sm:$0xff] %vm377_vm3, %v385_v21 }
 0x193 PF: > { %p387_p3 = scmp.eq.s32.totalorder %s719_s22, 1 }
 0x195   : > { %p388_p4 = pnand %p387_p3, %p268_p0 }
 0x196   : > { %v394_v22 = vld [vmem:[#allocation2] sm:$0xff] (!%p388_p4)  ;;  %vm405_vm4 = vcmask (!%p388_p4), 7168  }
 0x197   : > { %393 = sbr.rel (%p388_p4) target bundleno = 436 (0x1b4), region = 52  ;;  %v395_v24 = vmul.f32 (!%p388_p4), 0.001953125, %v394_v22  ;;  %v403_v30 = vld [vmem:[%s929_s3] sm:$0xff] (!%p388_p4) }
 0x198   : > { %v407_v33 = vld [vmem:[%s930_s4] sm:$0xff] (!%p388_p4) }
 0x199   : > { %v396_v23 = vld [vmem:[#allocation3] sm:$0xff] (!%p388_p4)  ;;  %v398_v26 = vmul.f32 (!%p388_p4), %v395_v24, %v395_v24 }
 0x19a   : > { %v397_v25 = vmul.f32 (!%p388_p4), 0.001953125, %v396_v23 }
 0x19c   : > { %v399_v27 = vsub.f32 (!%p388_p4), %v397_v25, %v398_v26 }
 0x19e   : > { %v400_v28 = vmax.f32 %v399_v27, 0.0 }
 0x1a0   : > { %v401_v29 = vadd.f32 1e-05, %v400_v28 }
 0x1a2   : > { %634 = vrsqrt.f32 %v401_v29 }
 0x1ac   : > { %v635_v31 = vpop.eup %634 }
 0x1ad   : > { %v404_v32 = vmul.f32 %v635_v31, %v403_v30 }
 0x1af   : > { %406 = vst.msk [vmem:[#allocation4] sm:$0xff] %vm405_vm4, %v404_v32  ;;  %v408_v34 = vmul.f32 %v404_v32, %v395_v24 }
 0x1b1   : > { %v409_v35 = vsub.f32 %v407_v33, %v408_v34 }
 0x1b3   : > { %410 = vst.msk [vmem:[#allocation5] sm:$0xff] %vm405_vm4, %v409_v35 }
 0x1b4 PF: > { %p549_p5 = scmp.ne.s32.totalorder %s719_s22, 1 }
 0x1b5   : > { %v736_v37 = vmov (!%p549_p5), 0  }
 0x1b6   : > { %413 = sbr.rel (%p549_p5) target bundleno = 576 (0x240), region = 56  ;;  %v414_v36 = vld [vmem:[#allocation4] sm:$0xff] (!%p549_p5)  ;;  %636 = vset.pattern.permute.xlu0 (!%p549_p5), %v736_v37 }
 0x1b7   : > { %417 = vperm.xlu0 (!%p549_p5), %636, %v414_v36  }
 0x1ba   : > { %v422_v38 = vld [vmem:[#allocation5] sm:$0xff] (!%p549_p5) }
 0x1bb   : > { %425 = vperm.xlu0 (!%p549_p5), %636, %v422_v38  }
 0x236   : > { %v418_v39 = vpop.permute.xlu0 %417 }
 0x237   : > { %v420_v40 = vmul.f32 %v418_v39, %v365_v9  ;;  %v421_v41 = vmul.f32 %v418_v39, %v367_v11 }
 0x23a   : > { %v426_v42 = vpop.permute.xlu0 %425 }
 0x23b   : > { %v428_v43 = vadd.f32 %v426_v42, %v420_v40  ;;  %v429_v44 = vadd.f32 %v426_v42, %v421_v41 }
 0x23d   : > { %v430_v45 = vmax.f32 %v428_v43, 0.0  ;;  %v431_v46 = vmax.f32 %v429_v44, 0.0 }
 0x23f   : > { %432 = vst [vmem:[%s851_s27] sm:$0xff] %v430_v45  ;;  %433 = vst [vmem:[%s851_s27 + $0x8] sm:$0xff] %v431_v46 }
 0x240 PF: > { %s442_s17 = smul.u32 %s715_s21, %s719_s22  ;;  %s453_s26 = sshll.u32 %s851_s27, 4  ;;  %s875_s26 = int_to_ptr.vmem [resolvable:$true] %s453_s26 }
 0x241   : > { %s435_s13 = scalar_lea.sflag [#allocation7], %s251_s12  ;;  %s637_s14 = scalar_lea.vmem %s875_s26, 256 }
 0x242   : > { %s556_s30 = sshll.u32 %s442_s17, 8  ;;  %p638_p7 = scmp.ne.s32.totalorder %s875_s26, %s637_s14 }
 0x243   : > { %s451_s10 = scalar_lea.hbm %s931_s5, %s556_s30  ;;  %s737_s15 = smov [#allocation6]  }
 0x244   : > { %p639_p9 = pnand %p638_p7, %p821_p6  ;;  %s641_s21 = sshll.u32 %s737_s15, 4  ;;  %s642_s21 = int_to_ptr.vmem [resolvable:$false] %s641_s21 }
 0x245   : > { %s643_s22 = scalar_lea.vmem %s642_s21, 512  ;;  %p644_p11 = scmp.lt.s32.totalorder %s875_s26, %s642_s21 }
 0x246   : > { %p640_p10 = pneg %p639_p9  ;;  %p645_p12 = scmp.lt.s32.totalorder %s643_s22, %s637_s14 }
 0x248   : > { %p646_p13 = por %p645_p12, %p644_p11 }
 0x24a   : > { %p647_p0 = pnand %p646_p13, %p640_p10 }
 0x24c   : > { %650 = shalt.err (!%p647_p0)
}
 0x24d   : > { %s651_s27 = scalar_lea.hbm %s451_s10, 256  ;;  %s655_s17 = scalar_lea.hbm %s931_s5, 512 }
 0x24e   : > { %p652_p1 = scmp.ne.s32.totalorder %s451_s10, %s651_s27  ;;  %p656_p4 = scmp.lt.u32.totalorder %s451_s10, %s931_s5 }
 0x24f   : > { %p657_p5 = scmp.lt.u32.totalorder %s655_s17, %s651_s27  ;;  %p659_p9 = scmp.lt.u32.totalorder %s651_s27, %s451_s10 }
 0x250   : > { %p653_p2 = pnand %p652_p1, %p821_p6 }
 0x251   : > { %p658_p7 = por %p657_p5, %p656_p4 }
 0x252   : > { %p654_p3 = pneg %p653_p2 }
 0x253   : > { %p660_p11 = por %p659_p9, %p658_p7 }
 0x255   : > { %p661_p10 = pnand %p660_p11, %p654_p3 }
 0x257   : > { %664 = shalt.err (!%p661_p10)
}
 0x258   : > { %557 = dma.vmem_to_hbm [thread:$0]  (%p821_p6), %s875_s26, 256, %s451_s10, %s435_s13  }
 0x259 PF: > { %p563_p12 = scmp.ge.s32.totalorder %s731_s25, 2  ;;  %s465_s9 = sand.u32 1, %s703_s18  }
 0x25a   : > { %s466_s14 = scalar_lea.sflag [#allocation7], %s465_s9 }
 0x25b   : > { %p560_p13 = pnand %p563_p12, %p828_p8 }
 0x25d   : > { %698 = dma.done.wait (!%p560_p13), %s466_s14, 256  }
 0x25e   : > { %700 = vsyncadd (!%p560_p13), %s466_s14, 4294967040  ;;  %s18_s25 = sadd.s32 1, %s731_s25   ;;  %s934_s18 = smov %s707_s19 }
 0x25f   : > { %p15_p0 = scmp.ge.s32.totalorder %s18_s25, 6   ;;  %s935_s19 = smov %s711_s20 }
 0x260   : > { %s936_s20 = smov %s837_s11  ;;  %s937_s21 = smov %s723_s23 }
 0x261   : > { %s938_s22 = smov %s727_s24  ;;  %s939_s23 = smov %s942_s28 }
 0x262   : > { %s940_s24 = smov %s946_s29  ;;  %17 = sbr.rel (!%p15_p0) target bundleno = 5 (0x5), region = 91 }
 0x269   :  { %471 = vsyncpa [#allocation7], 1 }
 0x26a   :  { %473 = vsyncpa [#allocation7 + $0x1], 1 }

</bundles_post_ra>
